<compile_context>
chip_gen: v5e
topology: v5e:2x2
jax: 0.10.0
libtpu: 0.0.40
codegen_flags: <defaults>
</compile_context>

<pallas_src>
import functools

import jax
import jax.numpy as jnp
from jax.experimental import pallas as pl
from jax.experimental.pallas import tpu as pltpu


def _round_up(x, m):
    return (x + m - 1) // m * m


def _fused_mlp_kernel(x_ref, w_ref, b_ref, o_ref, *, num_layers):
    # x_ref: [bm, D], w_ref: [L, D, D], b_ref: [L, 1, D], o_ref: [bm, D]
    # Static Python loop over layers: traced once; the activation `h` lives in
    # vregs/VMEM for the whole chain (zero HBM traffic between layers).
    h = x_ref[...]
    for l in range(num_layers):
        h = jnp.dot(h, w_ref[l], preferred_element_type=jnp.float32)
        h = h + b_ref[l]  # [1, D] bias broadcast
        if l < num_layers - 1:
            h = jnp.maximum(h, 0.0)  # ReLU on every layer except the last
    o_ref[...] = h.astype(o_ref.dtype)


@jax.jit
def fully_connected_nn(x, params):
    """Forward pass of the whole MLP as a single fused Pallas kernel.

    x: [B, input_dim] f32; params: list of (W=[in,out], b=[out]) f32.
    Returns [B, output_dim] f32.
    """
    B, IN = x.shape
    L = len(params)
    OUT = params[-1][0].shape[1]

    # Common lane-dense feature width: pad every layer's in/out dim to a single
    # multiple of 128. Zero padding keeps the math exact: padded input columns
    # are 0, padded weight rows/cols are 0, padded bias lanes are 0 -> padded
    # lanes stay 0 through every ReLU layer and are sliced off at the end.
    dims = [IN] + [w.shape[1] for w, _ in params]
    D = _round_up(max(dims), 128)

    # Batch tiling: sublane-align to 8; 128-row tiles for larger batches so the
    # grid can pipeline and shard across TensorCores.
    bm = 128 if B > 128 else _round_up(B, 8)
    B_p = _round_up(B, bm)

    # VMEM sanity: all padded weights stay resident (64 MiB/TC on v7x).
    weight_bytes = L * D * D * 4
    # TODO(synk): for very wide nets (weights approaching VMEM capacity), add a
    # layer grid axis and stream one weight slab per step instead.
    assert weight_bytes < 48 * 1024 * 1024, "weights too large to keep VMEM-resident"

    # Build padded, stacked operands (cheap; fused by XLA around the kernel).
    x_p = jnp.zeros((B_p, D), jnp.float32).at[:B, :IN].set(x)
    w_stack = jnp.zeros((L, D, D), jnp.float32)
    b_stack = jnp.zeros((L, 1, D), jnp.float32)
    for l, (w, b) in enumerate(params):
        fi, fo = w.shape
        w_stack = w_stack.at[l, :fi, :fo].set(w)
        b_stack = b_stack.at[l, 0, :fo].set(b)

    kernel = functools.partial(_fused_mlp_kernel, num_layers=L)
    out_p = pl.pallas_call(
        kernel,
        out_shape=jax.ShapeDtypeStruct((B_p, D), jnp.float32),
        grid=(B_p // bm,),
        in_specs=[
            # activation: one batch tile per grid step
            pl.BlockSpec((bm, D), lambda i: (i, 0)),
            # weights / biases: same block every step -> VMEM-resident, DMA'd once
            pl.BlockSpec((L, D, D), lambda i: (0, 0, 0)),
            pl.BlockSpec((L, 1, D), lambda i: (0, 0, 0)),
        ],
        out_specs=pl.BlockSpec((bm, D), lambda i: (i, 0)),
        compiler_params=pltpu.CompilerParams(
            # batch tiles are independent -> megacore sharding on v7x
            dimension_semantics=("parallel",),
        ),
    )(x_p, w_stack, b_stack)

    return out_p[:B, :OUT]


def init_params(key, input_dim, output_dim, hidden_width, hidden_depth):
    """Parameter init mirroring nn.Linear defaults.

    PyTorch nn.Linear(in, out) stores weight as [out, in]; we store W^T = [in, out].
    Uses uniform(-1/sqrt(fan_in), 1/sqrt(fan_in)) like PyTorch's default init.
    """
    dims = [input_dim] + [hidden_width] * hidden_depth + [output_dim]
    params = []
    for i in range(len(dims) - 1):
        fan_in, fan_out = dims[i], dims[i + 1]
        key, kw, kb = jax.random.split(key, 3)
        bound = 1.0 / jnp.sqrt(fan_in)
        w = jax.random.uniform(kw, (fan_in, fan_out), jnp.float32, -bound, bound)
        b = jax.random.uniform(kb, (fan_out,), jnp.float32, -bound, bound)
        params.append((w, b))
    return params


if __name__ == "__main__":
    # Small shapes consistent with the module: batch=8, input_dim=16,
    # hidden_width=32, hidden_depth=3, output_dim=8.
    batch = 8
    input_dim = 16
    output_dim = 8
    hidden_width = 32
    hidden_depth = 3

    key = jax.random.PRNGKey(0)
    key, kx = jax.random.split(key)
    x = jax.random.normal(kx, (batch, input_dim), jnp.float32)

    params = init_params(key, input_dim, output_dim, hidden_width, hidden_depth)

    out = fully_connected_nn(x, params)
    out = jax.block_until_ready(out)

    # Reference check in plain JAX (same math).
    ref = x
    for i, (w, b) in enumerate(params):
        ref = ref @ w + b
        if i < len(params) - 1:
            ref = jnp.maximum(ref, 0.0)
    assert out.shape == (batch, output_dim)
    assert jnp.allclose(out, ref, atol=1e-5, rtol=1e-5)

    print("KERNEL_OK")
</pallas_src>

<mosaic_0001>
module attributes {stable_mosaic.version = 11 : i64} {
  func.func @_fused_mlp_kernel(%arg0: i32, %arg1: memref<8x128xf32, #tpu.memory_space<vmem>>, %arg2: memref<4x128x128xf32, #tpu.memory_space<vmem>>, %arg3: memref<4x1x128xf32, #tpu.memory_space<vmem>>, %arg4: memref<8x128xf32, #tpu.memory_space<vmem>>) attributes {dimension_semantics = [#tpu.dimension_semantics<parallel>], iteration_bounds = array<i64: 1>, scalar_prefetch = 0 : i64, scratch_operands = 0 : i64, tpu.core_type = #tpu.core_type<tc>, window_params = [{transform_indices = @transform_0, window_bounds = array<i64: 8, 128>}, {pipeline_mode = #tpu.pipeline_mode<synchronous>, transform_indices = @transform_1, window_bounds = array<i64: 4, 128, 128>}, {pipeline_mode = #tpu.pipeline_mode<synchronous>, transform_indices = @transform_2, window_bounds = array<i64: 4, 1, 128>}, {transform_indices = @transform_3, window_bounds = array<i64: 8, 128>}]} {
    %c0 = arith.constant 0 : index
    %c0_0 = arith.constant 0 : index
    %0 = vector.load %arg1[%c0, %c0_0] : memref<8x128xf32, #tpu.memory_space<vmem>>, vector<8x128xf32>
    %c0_1 = arith.constant 0 : index
    %c0_2 = arith.constant 0 : index
    %c0_3 = arith.constant 0 : index
    %1 = vector.load %arg2[%c0_1, %c0_2, %c0_3] : memref<4x128x128xf32, #tpu.memory_space<vmem>>, vector<1x128x128xf32>
    %2 = vector.shape_cast %1 : vector<1x128x128xf32> to vector<128x128xf32>
    %cst = arith.constant dense<0.000000e+00> : vector<8x128xf32>
    %3 = tpu.matmul %0, %2, %cst {dimension_numbers = #tpu.dot_dimension_numbers<[1], [0], [0], [1], [0, 0, 1, 1], [], []>} : vector<8x128xf32>, vector<128x128xf32>, vector<8x128xf32> -> vector<8x128xf32>
    %c0_4 = arith.constant 0 : index
    %c0_5 = arith.constant 0 : index
    %c0_6 = arith.constant 0 : index
    %4 = vector.load %arg3[%c0_4, %c0_5, %c0_6] : memref<4x1x128xf32, #tpu.memory_space<vmem>>, vector<1x1x128xf32>
    %5 = vector.shape_cast %4 : vector<1x1x128xf32> to vector<1x128xf32>
    %6 = vector.broadcast %5 : vector<1x128xf32> to vector<8x128xf32>
    %7 = arith.addf %3, %6 : vector<8x128xf32>
    %cst_7 = arith.constant 0.000000e+00 : f32
    %8 = vector.broadcast %cst_7 : f32 to vector<8x128xf32>
    %9 = arith.maximumf %7, %8 : vector<8x128xf32>
    %c1 = arith.constant 1 : index
    %c0_8 = arith.constant 0 : index
    %c0_9 = arith.constant 0 : index
    %10 = vector.load %arg2[%c1, %c0_8, %c0_9] : memref<4x128x128xf32, #tpu.memory_space<vmem>>, vector<1x128x128xf32>
    %11 = vector.shape_cast %10 : vector<1x128x128xf32> to vector<128x128xf32>
    %cst_10 = arith.constant dense<0.000000e+00> : vector<8x128xf32>
    %12 = tpu.matmul %9, %11, %cst_10 {dimension_numbers = #tpu.dot_dimension_numbers<[1], [0], [0], [1], [0, 0, 1, 1], [], []>} : vector<8x128xf32>, vector<128x128xf32>, vector<8x128xf32> -> vector<8x128xf32>
    %c1_11 = arith.constant 1 : index
    %c0_12 = arith.constant 0 : index
    %c0_13 = arith.constant 0 : index
    %13 = vector.load %arg3[%c1_11, %c0_12, %c0_13] : memref<4x1x128xf32, #tpu.memory_space<vmem>>, vector<1x1x128xf32>
    %14 = vector.shape_cast %13 : vector<1x1x128xf32> to vector<1x128xf32>
    %15 = vector.broadcast %14 : vector<1x128xf32> to vector<8x128xf32>
    %16 = arith.addf %12, %15 : vector<8x128xf32>
    %cst_14 = arith.constant 0.000000e+00 : f32
    %17 = vector.broadcast %cst_14 : f32 to vector<8x128xf32>
    %18 = arith.maximumf %16, %17 : vector<8x128xf32>
    %c2 = arith.constant 2 : index
    %c0_15 = arith.constant 0 : index
    %c0_16 = arith.constant 0 : index
    %19 = vector.load %arg2[%c2, %c0_15, %c0_16] : memref<4x128x128xf32, #tpu.memory_space<vmem>>, vector<1x128x128xf32>
    %20 = vector.shape_cast %19 : vector<1x128x128xf32> to vector<128x128xf32>
    %cst_17 = arith.constant dense<0.000000e+00> : vector<8x128xf32>
    %21 = tpu.matmul %18, %20, %cst_17 {dimension_numbers = #tpu.dot_dimension_numbers<[1], [0], [0], [1], [0, 0, 1, 1], [], []>} : vector<8x128xf32>, vector<128x128xf32>, vector<8x128xf32> -> vector<8x128xf32>
    %c2_18 = arith.constant 2 : index
    %c0_19 = arith.constant 0 : index
    %c0_20 = arith.constant 0 : index
    %22 = vector.load %arg3[%c2_18, %c0_19, %c0_20] : memref<4x1x128xf32, #tpu.memory_space<vmem>>, vector<1x1x128xf32>
    %23 = vector.shape_cast %22 : vector<1x1x128xf32> to vector<1x128xf32>
    %24 = vector.broadcast %23 : vector<1x128xf32> to vector<8x128xf32>
    %25 = arith.addf %21, %24 : vector<8x128xf32>
    %cst_21 = arith.constant 0.000000e+00 : f32
    %26 = vector.broadcast %cst_21 : f32 to vector<8x128xf32>
    %27 = arith.maximumf %25, %26 : vector<8x128xf32>
    %c3 = arith.constant 3 : index
    %c0_22 = arith.constant 0 : index
    %c0_23 = arith.constant 0 : index
    %28 = vector.load %arg2[%c3, %c0_22, %c0_23] : memref<4x128x128xf32, #tpu.memory_space<vmem>>, vector<1x128x128xf32>
    %29 = vector.shape_cast %28 : vector<1x128x128xf32> to vector<128x128xf32>
    %cst_24 = arith.constant dense<0.000000e+00> : vector<8x128xf32>
    %30 = tpu.matmul %27, %29, %cst_24 {dimension_numbers = #tpu.dot_dimension_numbers<[1], [0], [0], [1], [0, 0, 1, 1], [], []>} : vector<8x128xf32>, vector<128x128xf32>, vector<8x128xf32> -> vector<8x128xf32>
    %c3_25 = arith.constant 3 : index
    %c0_26 = arith.constant 0 : index
    %c0_27 = arith.constant 0 : index
    %31 = vector.load %arg3[%c3_25, %c0_26, %c0_27] : memref<4x1x128xf32, #tpu.memory_space<vmem>>, vector<1x1x128xf32>
    %32 = vector.shape_cast %31 : vector<1x1x128xf32> to vector<1x128xf32>
    %33 = vector.broadcast %32 : vector<1x128xf32> to vector<8x128xf32>
    %34 = arith.addf %30, %33 : vector<8x128xf32>
    %c0_28 = arith.constant 0 : index
    %c0_29 = arith.constant 0 : index
    %35 = vector.load %arg4[%c0_28, %c0_29] : memref<8x128xf32, #tpu.memory_space<vmem>>, vector<8x128xf32>
    tpu.vector_store %arg4[%c0_28, %c0_29], %34 {strides = array<i32>} : memref<8x128xf32, #tpu.memory_space<vmem>>, vector<8x128xf32>,
    return
  }
  func.func @transform_0(%arg0: i32) -> (i32, i32) {
    %c0_i32 = arith.constant 0 : i32
    %c0_i32_0 = arith.constant 0 : i32
    return %arg0, %c0_i32 : i32, i32
  }
  func.func @transform_1(%arg0: i32) -> (i32, i32, i32) {
    %c0_i32 = arith.constant 0 : i32
    %c0_i32_0 = arith.constant 0 : i32
    %c0_i32_1 = arith.constant 0 : i32
    %c0_i32_2 = arith.constant 0 : i32
    return %c0_i32, %c0_i32_0, %c0_i32_1 : i32, i32, i32
  }
  func.func @transform_2(%arg0: i32) -> (i32, i32, i32) {
    %c0_i32 = arith.constant 0 : i32
    %c0_i32_0 = arith.constant 0 : i32
    %c0_i32_1 = arith.constant 0 : i32
    %c0_i32_2 = arith.constant 0 : i32
    return %c0_i32, %c0_i32_0, %c0_i32_1 : i32, i32, i32
  }
  func.func @transform_3(%arg0: i32) -> (i32, i32) {
    %c0_i32 = arith.constant 0 : i32
    %c0_i32_0 = arith.constant 0 : i32
    return %arg0, %c0_i32 : i32, i32
  }
}

</mosaic_0001>

<bundles_post_ra>
// kernel: fully_connected_nn.1
= control target key start
LH: loop header
LB: loop body
LE: loop exit
PB: predicated region body
PF: predicated region fallthrough
CT: control target
= control target key end

     0   :  { %s515_s0 = inlined_call_operand.vmem [shape: f32[8,128], index: 0, kind: input, shape index: {}]   ;;  %s516_s1 = inlined_call_operand.vmem [shape: f32[4,128,128], index: 1, kind: input, shape index: {}]   ;;  %s517_s2 = inlined_call_operand.vmem [shape: f32[4,1,128], index: 2, kind: input, shape index: {}]   ;;  %s518_s3 = inlined_call_operand.hbm [shape: f32[8,128], index: 3, kind: output, shape index: {}]  }
   0x1   :  { %v31_v0 = vld [vmem:[%s516_s1 + $0x78] sm:$0xff]  ;;  %v30_v1 = vld [vmem:[%s516_s1 + $0x70] sm:$0xff]  ;;  %v29_v2 = vld [vmem:[%s516_s1 + $0x68] sm:$0xff] }
   0x2   :  { %36 = vmatpush.msra.mxu0 %v31_v0  ;;  %v28_v3 = vld [vmem:[%s516_s1 + $0x60] sm:$0xff]  ;;  %v217_v4 = vld [vmem:[%s516_s1 + $0xf8] sm:$0xff]  ;;  %v216_v6 = vld [vmem:[%s516_s1 + $0xf0] sm:$0xff] }
   0x3   :  { %v27_v5 = vld [vmem:[%s516_s1 + $0x58] sm:$0xff]  ;;  %79 = vmatpush.msra.mxu1 %v217_v4  ;;  %v215_v7 = vld [vmem:[%s516_s1 + $0xe8] sm:$0xff]  ;;  %v26_v8 = vld [vmem:[%s516_s1 + $0x50] sm:$0xff] }
   0x4   :  { %37 = vmatpush.msra.mxu0 %v30_v1  ;;  %v25_v9 = vld [vmem:[%s516_s1 + $0x48] sm:$0xff]  ;;  %v214_v10 = vld [vmem:[%s516_s1 + $0xe0] sm:$0xff]  ;;  %v213_v11 = vld [vmem:[%s516_s1 + $0xd8] sm:$0xff] }
   0x5   :  { %80 = vmatpush.msra.mxu1 %v216_v6 }
   0x6   :  { %38 = vmatpush.msra.mxu0 %v29_v2 }
   0x7   :  { %81 = vmatpush.msra.mxu1 %v215_v7 }
   0x8   :  { %39 = vmatpush.msra.mxu0 %v28_v3 }
   0xa   :  { %40 = vmatpush.msra.mxu0 %v27_v5 }
   0xc   :  { %41 = vmatpush.msra.mxu0 %v26_v8 }
   0xd   :  { %8 = vsyncpa [#allocation3], 0  ;;  %v24_v12 = vld [vmem:[%s516_s1 + $0x40] sm:$0xff]  ;;  %82 = vmatpush.msra.mxu1 %v214_v10  ;;  %v212_v13 = vld [vmem:[%s516_s1 + $0xd0] sm:$0xff]  ;;  %s284_s12 = smov [#allocation2]   ;;  %s193_s16 = sshll.u32 %s518_s3, 4  ;;  %s194_s16 = int_to_ptr.hbm [resolvable:$true] %s193_s16 }
   0xe   :  { %42 = vmatpush.msra.mxu0 %v25_v9  ;;  %v23_v14 = vld [vmem:[%s516_s1 + $0x38] sm:$0xff]  ;;  %v211_v15 = vld [vmem:[%s516_s1 + $0xc8] sm:$0xff]  ;;  %v22_v16 = vld [vmem:[%s516_s1 + $0x30] sm:$0xff]  ;;  %s191_s13 = sshll.u32 %s284_s12, 4  ;;  %s192_s13 = int_to_ptr.vmem [resolvable:$true] %s191_s13 }
   0xf   :  { %83 = vmatpush.msra.mxu1 %v213_v11  ;;  %v210_v17 = vld [vmem:[%s516_s1 + $0xc0] sm:$0xff]  ;;  %v21_v18 = vld [vmem:[%s516_s1 + $0x28] sm:$0xff]  ;;  %v209_v19 = vld [vmem:[%s516_s1 + $0xb8] sm:$0xff] }
  0x10   :  { %43 = vmatpush.msra.mxu0 %v24_v12  ;;  %v20_v20 = vld [vmem:[%s516_s1 + $0x20] sm:$0xff]  ;;  %v208_v21 = vld [vmem:[%s516_s1 + $0xb0] sm:$0xff]  ;;  %v19_v22 = vld [vmem:[%s516_s1 + $0x18] sm:$0xff] }
  0x11   :  { %84 = vmatpush.msra.mxu1 %v212_v13  ;;  %v207_v23 = vld [vmem:[%s516_s1 + $0xa8] sm:$0xff]  ;;  %v18_v24 = vld [vmem:[%s516_s1 + $0x10] sm:$0xff]  ;;  %v206_v25 = vld [vmem:[%s516_s1 + $0xa0] sm:$0xff] }
  0x12   :  { %44 = vmatpush.msra.mxu0 %v23_v14  ;;  %v17_v26 = vld [vmem:[%s516_s1 + $0x8] sm:$0xff]  ;;  %v205_v27 = vld [vmem:[%s516_s1 + $0x98] sm:$0xff]  ;;  %v16_v28 = vld [vmem:[%s516_s1] sm:$0xff] }
  0x13   :  { %85 = vmatpush.msra.mxu1 %v211_v15  ;;  %v15_v29 = vld [vmem:[%s515_s0] sm:$0xff]  ;;  %v204_v30 = vld [vmem:[%s516_s1 + $0x90] sm:$0xff]  ;;  %v203_v31 = vld [vmem:[%s516_s1 + $0x88] sm:$0xff] }
  0x14   :  { %45 = vmatpush.msra.mxu0 %v22_v16  ;;  %v202_v32 = vld [vmem:[%s516_s1 + $0x80] sm:$0xff]  ;;  %v234_v33 = vld [vmem:[%s516_s1 + $0x178] sm:$0xff]  ;;  %v233_v34 = vld [vmem:[%s516_s1 + $0x170] sm:$0xff] }
  0x15   :  { %86 = vmatpush.msra.mxu1 %v210_v17  ;;  %122 = vmatpush.msra.mxu2 %v234_v33  ;;  %v232_v35 = vld [vmem:[%s516_s1 + $0x168] sm:$0xff]  ;;  %v231_v36 = vld [vmem:[%s516_s1 + $0x160] sm:$0xff]  ;;  %v230_v37 = vld [vmem:[%s516_s1 + $0x158] sm:$0xff] }
  0x16   :  { %46 = vmatpush.msra.mxu0 %v21_v18  ;;  %v229_v38 = vld [vmem:[%s516_s1 + $0x150] sm:$0xff]  ;;  %v228_v39 = vld [vmem:[%s516_s1 + $0x148] sm:$0xff]  ;;  %v227_v40 = vld [vmem:[%s516_s1 + $0x140] sm:$0xff] }
  0x17   :  { %87 = vmatpush.msra.mxu1 %v209_v19  ;;  %123 = vmatpush.msra.mxu2 %v233_v34  ;;  %v226_v41 = vld [vmem:[%s516_s1 + $0x138] sm:$0xff]  ;;  %v225_v42 = vld [vmem:[%s516_s1 + $0x130] sm:$0xff]  ;;  %v224_v43 = vld [vmem:[%s516_s1 + $0x128] sm:$0xff] }
  0x18   :  { %47 = vmatpush.msra.mxu0 %v20_v20  ;;  %v223_v44 = vld [vmem:[%s516_s1 + $0x120] sm:$0xff]  ;;  %v222_v45 = vld [vmem:[%s516_s1 + $0x118] sm:$0xff]  ;;  %v221_v50 = vld [vmem:[%s516_s1 + $0x110] sm:$0xff] }
  0x19   :  { %88 = vmatpush.msra.mxu1 %v208_v21  ;;  %124 = vmatpush.msra.mxu2 %v232_v35  ;;  %v254_v46 = vld [vmem:[%s517_s2] ss:$0 sm:$0xff]  ;;  %v220_v51 = vld [vmem:[%s516_s1 + $0x108] sm:$0xff]  ;;  %v251_v53 = vld [vmem:[%s516_s1 + $0x1f8] sm:$0xff] }
  0x1a   :  { %48 = vmatpush.msra.mxu0 %v19_v22  ;;  %v219_v52 = vld [vmem:[%s516_s1 + $0x100] sm:$0xff]  ;;  %v250_v54 = vld [vmem:[%s516_s1 + $0x1f0] sm:$0xff]  ;;  %165 = vmatpush.msra.mxu3 %v251_v53  ;;  %v249_v55 = vld [vmem:[%s516_s1 + $0x1e8] sm:$0xff] }
  0x1b   :  { %89 = vmatpush.msra.mxu1 %v207_v23  ;;  %125 = vmatpush.msra.mxu2 %v231_v36  ;;  %v248_v56 = vld [vmem:[%s516_s1 + $0x1e0] sm:$0xff]  ;;  %v247_v57 = vld [vmem:[%s516_s1 + $0x1d8] sm:$0xff]  ;;  %v246_v58 = vld [vmem:[%s516_s1 + $0x1d0] sm:$0xff] }
  0x1c   :  { %49 = vmatpush.msra.mxu0 %v18_v24  ;;  %166 = vmatpush.msra.mxu3 %v250_v54  ;;  %v245_v59 = vld [vmem:[%s516_s1 + $0x1c8] sm:$0xff]  ;;  %v244_v60 = vld [vmem:[%s516_s1 + $0x1c0] sm:$0xff]  ;;  %v243_v61 = vld [vmem:[%s516_s1 + $0x1b8] sm:$0xff] }
  0x1d   :  { %90 = vmatpush.msra.mxu1 %v206_v25  ;;  %126 = vmatpush.msra.mxu2 %v230_v37  ;;  %v242_v62 = vld [vmem:[%s516_s1 + $0x1b0] sm:$0xff]  ;;  %v241_v63 = vld [vmem:[%s516_s1 + $0x1a8] sm:$0xff]  ;;  %v240_v0 = vld [vmem:[%s516_s1 + $0x1a0] sm:$0xff] }
  0x1e   :  { %50 = vmatpush.msra.mxu0 %v17_v26  ;;  %167 = vmatpush.msra.mxu3 %v249_v55  ;;  %v239_v1 = vld [vmem:[%s516_s1 + $0x198] sm:$0xff]  ;;  %v255_v2 = vld [vmem:[%s517_s2 + $0x1] ss:$0 sm:$0xff]  ;;  %v238_v6 = vld [vmem:[%s516_s1 + $0x190] sm:$0xff] }
  0x1f   :  { %91 = vmatpush.msra.mxu1 %v205_v27  ;;  %127 = vmatpush.msra.mxu2 %v229_v38  ;;  %v237_v7 = vld [vmem:[%s516_s1 + $0x188] sm:$0xff]  ;;  %v236_v8 = vld [vmem:[%s516_s1 + $0x180] sm:$0xff] }
  0x20   :  { %51 = vmatpush.msra.mxu0 %v16_v28  ;;  %168 = vmatpush.msra.mxu3 %v248_v56  ;;  %v256_v9 = vld [vmem:[%s517_s2 + $0x2] ss:$0 sm:$0xff]  ;;  %v257_v13 = vld [vmem:[%s517_s2 + $0x3] ss:$0 sm:$0xff] }
  0x21   :  { %52 = vmatmul.f32.vlgmr.msra.gmra.mxu0 %v15_v29  ;;  %92 = vmatpush.msra.mxu1 %v204_v30 }
  0x22   :  { %128 = vmatpush.msra.mxu2 %v228_v39  ;;  %169 = vmatpush.msra.mxu3 %v247_v57 }
  0x23   :  { %93 = vmatpush.msra.mxu1 %v203_v31 }
  0x24   :  { %129 = vmatpush.msra.mxu2 %v227_v40  ;;  %170 = vmatpush.msra.mxu3 %v246_v58 }
  0x25   :  { %94 = vmatpush.msra.mxu1 %v202_v32 }
  0x26   :  { %130 = vmatpush.msra.mxu2 %v226_v41  ;;  %171 = vmatpush.msra.mxu3 %v245_v59 }
  0x28   :  { %131 = vmatpush.msra.mxu2 %v225_v42  ;;  %172 = vmatpush.msra.mxu3 %v244_v60 }
  0x2a   :  { %132 = vmatpush.msra.mxu2 %v224_v43  ;;  %173 = vmatpush.msra.mxu3 %v243_v61 }
  0x2c   :  { %133 = vmatpush.msra.mxu2 %v223_v44  ;;  %174 = vmatpush.msra.mxu3 %v242_v62 }
  0x2e   :  { %134 = vmatpush.msra.mxu2 %v222_v45  ;;  %175 = vmatpush.msra.mxu3 %v241_v63 }
  0x30   :  { %135 = vmatpush.msra.mxu2 %v221_v50  ;;  %176 = vmatpush.msra.mxu3 %v240_v0 }
  0x32   :  { %136 = vmatpush.msra.mxu2 %v220_v51  ;;  %177 = vmatpush.msra.mxu3 %v239_v1 }
  0x34   :  { %137 = vmatpush.msra.mxu2 %v219_v52  ;;  %178 = vmatpush.msra.mxu3 %v238_v6 }
  0x36   :  { %179 = vmatpush.msra.mxu3 %v237_v7 }
  0x38   :  { %180 = vmatpush.msra.mxu3 %v236_v8 }
  0x9e   :  { %v53_v47 = vpop.f32.mrf.mxu0 }
  0x9f   :  { %v54_v48 = vadd.f32 %v254_v46, %v53_v47 }
  0xa1   :  { %v56_v49 = vmax.f32 %v54_v48, 0.0 }
  0xa3   :  { %95 = vmatmul.f32.vlgmr.msra.gmra.mxu1 %v56_v49 }
 0x120   :  { %v96_v3 = vpop.f32.mrf.mxu1 }
 0x121   :  { %v97_v4 = vadd.f32 %v255_v2, %v96_v3 }
 0x123   :  { %v99_v5 = vmax.f32 %v97_v4, 0.0 }
 0x125   :  { %138 = vmatmul.f32.vlgmr.msra.gmra.mxu2 %v99_v5 }
 0x1a8   :  { %v139_v10 = vpop.f32.mrf.mxu2 }
 0x1a9   :  { %v140_v11 = vadd.f32 %v256_v9, %v139_v10 }
 0x1ab   :  { %v142_v12 = vmax.f32 %v140_v11, 0.0 }
 0x1ad   :  { %181 = vmatmul.f32.vlgmr.msra.gmra.mxu3 %v142_v12 }
 0x230   :  { %v182_v14 = vpop.f32.mrf.mxu3 }
 0x231   :  { %v183_v15 = vadd.f32 %v257_v13, %v182_v14 }
 0x233   :  { %185 = vst [vmem:[#allocation2] sm:$0xff] %v183_v15 }
 0x234   :  { %196 = dma.vmem_to_hbm [thread:$0]  %s192_s13, 128, %s194_s16, [#allocation3]  }
 0x235   :  { %282 = dma.done.wait [#allocation3], 128  }
 0x236   :  { %283 = vsyncadd [#allocation3], 4294967168 }
 0x237   :  { %201 = vsyncpa [#allocation3], 1 }

</bundles_post_ra>
